<compile_context>
chip_gen: v5e
topology: v5e:2x2
jax: 0.10.0
libtpu: 0.0.40
codegen_flags: <defaults>
</compile_context>

<pallas_src>
import functools
import math

import jax
import jax.numpy as jnp
from jax.experimental import pallas as pl
from jax.experimental.pallas import tpu as pltpu

_TARGET_BLOCK_BYTES = 2 * 1024 * 1024   # ~2 MiB input blocks (x2 for double buffer)
_VMEM_LIMIT_BYTES = 32 * 1024 * 1024    # safe on v5e/v6e/v7x


def _round_up(x, m):
    return ((x + m - 1) // m) * m


def _choose_tile(size, unit, cap):
    """Pick (tile, padded_size) for one block dim.

    A tile equal to the full (un-padded) extent is always legal; otherwise the
    tile is a multiple of `unit` and divides the padded size.
    """
    if size <= cap:
        return size, size                      # full extent, no padding
    if size % unit == 0:
        t = (cap // unit) * unit
        while t >= unit:
            if size % t == 0:
                return t, size                 # exact divisor, no padding
            t -= unit
    tile = (cap // unit) * unit
    return tile, _round_up(size, tile)         # zero-pad up to a tile multiple


def _acc_dtype(dtype):
    return jnp.float32 if jnp.issubdtype(dtype, jnp.floating) else jnp.int32


# --------------------------------------------------------------------------
# Kernel 1: reduce the LAST (lane) axis of a (M, N) slab.
# Grid = (M tiles [parallel], N tiles [arbitrary, innermost]).
# --------------------------------------------------------------------------
def _sum_lane_kernel(x_ref, o_ref, acc_ref):
    k = pl.program_id(1)  # reduction grid axis

    @pl.when(k == 0)
    def _():
        acc_ref[...] = jnp.zeros_like(acc_ref)

    acc_ref[...] += jnp.sum(
        x_ref[...].astype(acc_ref.dtype), axis=-1, keepdims=True)

    @pl.when(k == pl.num_programs(1) - 1)
    def _():
        o_ref[...] = acc_ref[...].astype(o_ref.dtype)


def _sum_lane(x2):
    """Sum a (M, N) array over its last axis -> (M,)."""
    M, N = x2.shape
    itemsize = jnp.dtype(x2.dtype).itemsize
    acc_dt = _acc_dtype(x2.dtype)

    tn, n_pad = _choose_tile(N, 128, 2048)
    tm_cap = max(8, min(1024, (_TARGET_BLOCK_BYTES // (tn * itemsize)) // 8 * 8))
    tm, m_pad = _choose_tile(M, 8, tm_cap)

    if (m_pad, n_pad) != (M, N):
        x2 = jnp.pad(x2, ((0, m_pad - M), (0, n_pad - N)))

    grid = (m_pad // tm, n_pad // tn)
    out = pl.pallas_call(
        _sum_lane_kernel,
        out_shape=jax.ShapeDtypeStruct((m_pad, 1), x2.dtype),
        grid_spec=pltpu.PrefetchScalarGridSpec(
            num_scalar_prefetch=0,
            grid=grid,
            in_specs=[pl.BlockSpec((tm, tn), lambda i, k: (i, k))],
            out_specs=pl.BlockSpec((tm, 1), lambda i, k: (i, 0)),
            scratch_shapes=[pltpu.VMEM((tm, 1), acc_dt)],
        ),
        compiler_params=pltpu.CompilerParams(
            dimension_semantics=("parallel", "arbitrary"),
            vmem_limit_bytes=_VMEM_LIMIT_BYTES,
        ),
    )(x2)
    return out[:M, 0]


# --------------------------------------------------------------------------
# Kernel 2: reduce the MIDDLE (sublane) axis of a (pre, red, post) slab.
# No wrapper transpose; `post` stays lane-dense in both input and output.
# Grid = (pre tiles [parallel], post tiles [parallel], red tiles [arbitrary]).
# --------------------------------------------------------------------------
def _sum_sublane_kernel(x_ref, o_ref, acc_ref):
    r = pl.program_id(2)  # reduction grid axis

    @pl.when(r == 0)
    def _():
        acc_ref[...] = jnp.zeros_like(acc_ref)

    acc_ref[...] += jnp.sum(x_ref[...].astype(acc_ref.dtype), axis=1)

    @pl.when(r == pl.num_programs(2) - 1)
    def _():
        o_ref[...] = acc_ref[...].astype(o_ref.dtype)


def _sum_sublane(x3):
    """Sum a (P, R, Q) array over its middle axis -> (P, Q)."""
    P, R, Q = x3.shape
    itemsize = jnp.dtype(x3.dtype).itemsize
    acc_dt = _acc_dtype(x3.dtype)

    tq, q_pad = _choose_tile(Q, 128, 1024)
    tr, r_pad = _choose_tile(R, 8, 128)
    tp_cap = max(8, min(1024, (_TARGET_BLOCK_BYTES // (tr * tq * itemsize)) // 8 * 8))
    tp, p_pad = _choose_tile(P, 8, tp_cap)

    if (p_pad, r_pad, q_pad) != (P, R, Q):
        x3 = jnp.pad(x3, ((0, p_pad - P), (0, r_pad - R), (0, q_pad - Q)))

    grid = (p_pad // tp, q_pad // tq, r_pad // tr)
    out = pl.pallas_call(
        _sum_sublane_kernel,
        out_shape=jax.ShapeDtypeStruct((p_pad, q_pad), x3.dtype),
        grid_spec=pltpu.PrefetchScalarGridSpec(
            num_scalar_prefetch=0,
            grid=grid,
            in_specs=[pl.BlockSpec((tp, tr, tq), lambda p, q, r: (p, r, q))],
            out_specs=pl.BlockSpec((tp, tq), lambda p, q, r: (p, q)),
            scratch_shapes=[pltpu.VMEM((tp, tq), acc_dt)],
        ),
        compiler_params=pltpu.CompilerParams(
            dimension_semantics=("parallel", "parallel", "arbitrary"),
            vmem_limit_bytes=_VMEM_LIMIT_BYTES,
        ),
    )(x3)
    return out[:P, :Q]


# --------------------------------------------------------------------------
# Wrapper: SumPool.forward == torch.sum(feat, dim, keepdim)
# --------------------------------------------------------------------------
@functools.partial(jax.jit, static_argnames=("dim", "keepdim"))
def sum_pool(feat, *, dim, keepdim):
    if feat.dtype == jnp.bool_:
        # TODO(synk): torch promotes bool/int sums to int64; JAX x64 is off by
        # default, so bool is summed in int32 here.
        feat = feat.astype(jnp.int32)

    ndim = feat.ndim
    axis = dim % ndim
    shape = feat.shape
    red = shape[axis]
    post = math.prod(shape[axis + 1:])

    if axis == ndim - 1 or post * 3 < 128:
        # Lane-reduction path. For non-last axes this needs a transpose, but it
        # is only taken when `post` is so small that lane padding would cost
        # more than the transposed copy.
        x = feat if axis == ndim - 1 else jnp.moveaxis(feat, axis, -1)
        m = math.prod(x.shape[:-1])
        res = _sum_lane(x.reshape(m, red))
    else:
        # Sublane-reduction path: no transpose, `post` stays on lanes.
        pre = math.prod(shape[:axis])
        res = _sum_sublane(feat.reshape(pre, red, post))

    out = res.reshape(shape[:axis] + shape[axis + 1:])
    if keepdim:
        out = jnp.expand_dims(out, axis)
    return out


if __name__ == "__main__":
    key = jax.random.PRNGKey(0)
    B, C, N = 2, 8, 256
    feat = jax.random.normal(key, (B, C, N), dtype=jnp.float32)

    checks = []

    def _check(out, ref, atol=1e-4, rtol=1e-4):
        jax.block_until_ready(out)
        checks.append(out.shape == ref.shape
                      and bool(jnp.allclose(out.astype(jnp.float32),
                                            ref.astype(jnp.float32),
                                            atol=atol, rtol=rtol)))

    # Last-axis reduction (lane kernel).
    _check(sum_pool(feat, dim=2, keepdim=True), jnp.sum(feat, axis=2, keepdims=True))
    _check(sum_pool(feat, dim=-1, keepdim=False), jnp.sum(feat, axis=-1))

    # Inner-axis reductions (sublane kernel, no transpose).
    _check(sum_pool(feat, dim=1, keepdim=False), jnp.sum(feat, axis=1))
    _check(sum_pool(feat, dim=0, keepdim=True), jnp.sum(feat, axis=0, keepdims=True))

    # Ragged shapes exercise full-extent tiles / zero padding.
    feat2 = jax.random.normal(jax.random.PRNGKey(0), (2, 5, 300), dtype=jnp.float32)
    _check(sum_pool(feat2, dim=1, keepdim=False), jnp.sum(feat2, axis=1))
    _check(sum_pool(feat2, dim=2, keepdim=False), jnp.sum(feat2, axis=2))

    # Multi-step reductions (accumulator across grid steps + padding of red).
    feat3 = jax.random.normal(jax.random.PRNGKey(0), (2, 8, 4096), dtype=jnp.float32)
    _check(sum_pool(feat3, dim=2, keepdim=False), jnp.sum(feat3, axis=2))
    feat4 = jax.random.normal(jax.random.PRNGKey(0), (2, 300, 256), dtype=jnp.float32)
    _check(sum_pool(feat4, dim=1, keepdim=True), jnp.sum(feat4, axis=1, keepdims=True))

    # bf16 input: f32 accumulation inside the kernel.
    featb = feat.astype(jnp.bfloat16)
    ref_b = jnp.sum(featb.astype(jnp.float32), axis=2).astype(jnp.bfloat16)
    _check(sum_pool(featb, dim=2, keepdim=False), ref_b, atol=5e-2, rtol=2e-2)

    if all(checks):
        print("KERNEL_OK")
    else:
        raise SystemExit("mismatch vs jnp.sum reference")
</pallas_src>

<mosaic_0001>
module attributes {stable_mosaic.version = 11 : i64} {
  func.func @_sum_lane_kernel(%arg0: i32, %arg1: i32, %arg2: memref<16x256xf32, #tpu.memory_space<vmem>>, %arg3: memref<16x1xf32, #tpu.memory_space<vmem>>, %arg4: memref<16x1xf32, #tpu.memory_space<vmem>>) attributes {dimension_semantics = [#tpu.dimension_semantics<parallel>, #tpu.dimension_semantics<arbitrary>], iteration_bounds = array<i64: 1, 1>, scalar_prefetch = 0 : i64, scratch_operands = 1 : i64, tpu.core_type = #tpu.core_type<tc>, window_params = [{transform_indices = @transform_0, window_bounds = array<i64: 16, 256>}, {transform_indices = @transform_1, window_bounds = array<i64: 16, 1>}]} {
    %c0_i32 = arith.constant 0 : i32
    %0 = arith.cmpi eq, %arg1, %c0_i32 : i32
    %1 = arith.extui %0 : i1 to i32
    %c0_i32_0 = arith.constant 0 : i32
    %2 = arith.cmpi ne, %1, %c0_i32_0 : i32
    scf.if %2 {
      %cst_8 = arith.constant 0.000000e+00 : f32
      %12 = vector.broadcast %cst_8 : f32 to vector<16x1xf32>
      %c0_9 = arith.constant 0 : index
      %c0_10 = arith.constant 0 : index
      %13 = vector.load %arg4[%c0_9, %c0_10] : memref<16x1xf32, #tpu.memory_space<vmem>>, vector<16x1xf32>
      tpu.vector_store %arg4[%c0_9, %c0_10], %12 {strides = array<i32>} : memref<16x1xf32, #tpu.memory_space<vmem>>, vector<16x1xf32>,
    } else {
    }
    %c0 = arith.constant 0 : index
    %c0_1 = arith.constant 0 : index
    %3 = vector.load %arg4[%c0, %c0_1] : memref<16x1xf32, #tpu.memory_space<vmem>>, vector<16x1xf32>
    %c0_2 = arith.constant 0 : index
    %c0_3 = arith.constant 0 : index
    %4 = vector.load %arg2[%c0_2, %c0_3] : memref<16x256xf32, #tpu.memory_space<vmem>>, vector<16x256xf32>
    %cst = arith.constant dense<0.000000e+00> : vector<16xf32>
    %5 = vector.multi_reduction <add>, %4, %cst [1] : vector<16x256xf32> to vector<16xf32>
    %6 = vector.shape_cast %5 : vector<16xf32> to vector<16x1xf32>
    %7 = arith.addf %3, %6 : vector<16x1xf32>
    %c0_4 = arith.constant 0 : index
    %c0_5 = arith.constant 0 : index
    %8 = vector.load %arg4[%c0_4, %c0_5] : memref<16x1xf32, #tpu.memory_space<vmem>>, vector<16x1xf32>
    tpu.vector_store %arg4[%c0_4, %c0_5], %7 {strides = array<i32>} : memref<16x1xf32, #tpu.memory_space<vmem>>, vector<16x1xf32>,
    %c0_i32_6 = arith.constant 0 : i32
    %9 = arith.cmpi eq, %arg1, %c0_i32_6 : i32
    %10 = arith.extui %9 : i1 to i32
    %c0_i32_7 = arith.constant 0 : i32
    %11 = arith.cmpi ne, %10, %c0_i32_7 : i32
    scf.if %11 {
      %c0_8 = arith.constant 0 : index
      %c0_9 = arith.constant 0 : index
      %12 = vector.load %arg4[%c0_8, %c0_9] : memref<16x1xf32, #tpu.memory_space<vmem>>, vector<16x1xf32>
      %c0_10 = arith.constant 0 : index
      %c0_11 = arith.constant 0 : index
      %13 = vector.load %arg3[%c0_10, %c0_11] : memref<16x1xf32, #tpu.memory_space<vmem>>, vector<16x1xf32>
      tpu.vector_store %arg3[%c0_10, %c0_11], %12 {strides = array<i32>} : memref<16x1xf32, #tpu.memory_space<vmem>>, vector<16x1xf32>,
    } else {
    }
    return
  }
  func.func @transform_0(%arg0: i32, %arg1: i32) -> (i32, i32) {
    %c0_i32 = arith.constant 0 : i32
    return %arg0, %arg1 : i32, i32
  }
  func.func @transform_1(%arg0: i32, %arg1: i32) -> (i32, i32) {
    %c0_i32 = arith.constant 0 : i32
    %c0_i32_0 = arith.constant 0 : i32
    return %arg0, %c0_i32 : i32, i32
  }
}

</mosaic_0001>

<bundles_post_ra>
// kernel: squeeze.1
= control target key start
LH: loop header
LB: loop body
LE: loop exit
PB: predicated region body
PF: predicated region fallthrough
CT: control target
= control target key end

     0   :  { %s80_s0 = inlined_call_operand.vmem [shape: f32[16], index: 0, kind: input, shape index: {}]   ;;  %s81_s1 = inlined_call_operand.hbm [shape: f32[2,8,1], index: 1, kind: output, shape index: {}]  }
   0x1   :  { %v5_v0 = vld [vmem:[%s80_s0] sm:$0x1] }
   0x2   :  { %2 = vsyncpa [#allocation1], 0  ;;  %6 = vst [vmem:[#allocation3] sm:$0x1] %v5_v0  ;;  %vm8_vm0 = vcmask 64512   ;;  %s62_s0 = smov 120  }
   0x3   :  { %s63_s8 = smov [#allocation0]   ;;  %s27_s1 = sshll.u32 %s81_s1, 4  ;;  %s28_s1 = int_to_ptr.hbm [resolvable:$true] %s27_s1 }
   0x4   :  { %s25_s9 = sshll.u32 %s63_s8, 4  ;;  %s26_s9 = int_to_ptr.vmem [resolvable:$true] %s25_s9 }
   0x9   :  { %v10_v1 = vld [vmem:[#allocation3] sm:$0x1]  }
   0xa   :  { %v7_v2 = vld [vmem:[#allocation3] sm:$0x1]   ;;  %11 = vrot.lane.b32.xlu0 %v10_v1, %s62_s0 }
   0xb   :  { %9 = vst.msk [vmem:[#allocation2] sm:$0x1] %vm8_vm0, %v7_v2  }
  0x7c   :  { %v12_v3 = vpop.permute.xlu0 %11  }
  0x7d   :  { %15 = vst.msk [vmem:[#allocation2 + $0x1] sm:$0x1] %vm8_vm0, %v12_v3  }
  0x84   :  { %v18_v4 = vld [vmem:[#allocation2] sm:$0x3] }
  0x85   :  { %21 = vst [vmem:[#allocation0] sm:$0x3] %v18_v4 }
  0x86   :  { %30 = dma.vmem_to_hbm [thread:$0]  %s26_s9, 32, %s28_s1, [#allocation1]  }
  0x87   :  { %60 = dma.done.wait [#allocation1], 32  }
  0x88   :  { %61 = vsyncadd [#allocation1], 4294967264 }
  0x89   :  { %33 = vsyncpa [#allocation1], 1 }

// kernel: sum_pool.1
= control target key start
LH: loop header
LB: loop body
LE: loop exit
PB: predicated region body
PF: predicated region fallthrough
CT: control target
= control target key end

     0   :  { %6 = vsyncpa [#allocation4], 0  ;;  %s90_s9 = smov [#allocation3]   ;;  %s91_s11 = smov 256   ;;  %s119_s0 = inlined_call_operand.hbm [shape: f32[16,256], index: 0, kind: input, shape index: {}]   ;;  %s120_s1 = inlined_call_operand.vmem [shape: f32[16,1], index: 1, kind: output, shape index: {}]  }
   0x1   :  { %s11_s8 = sshll.u32 %s119_s0, 4  ;;  %s13_s10 = sshll.u32 %s90_s9, 4  ;;  %s12_s8 = int_to_ptr.hbm [resolvable:$true] %s11_s8  ;;  %s14_s10 = int_to_ptr.vmem [resolvable:$true] %s13_s10 }
   0x2   :  { %s92_s12 = smov 16  }
   0x3   :  { %19 = dma.hbm_to_vmem [thread:$0]  %s12_s8, 512, %s14_s10, [#allocation4], %s91_s11, %s91_s11, %s92_s12  }
   0x4   :  { %88 = dma.done.wait [#allocation4], 512  }
   0x5   :  { %89 = vsyncadd [#allocation4], 4294966784  ;;  %vm28_vm0 = vcmask 7168   ;;  %v93_v0 = vmov 0.0   ;;  %v33_v1 = vld [vmem:[#allocation3] sm:$0xff]  ;;  %v34_v2 = vld [vmem:[#allocation3 + $0x8] sm:$0xff] }
   0x6   :  { %29 = vst.msk [vmem:[#allocation2] sm:$0xff] %vm28_vm0, %v93_v0  ;;  %v37_v3 = vadd.f32 %v34_v2, %v33_v1  ;;  %v35_v4 = vld [vmem:[#allocation3 + $0x10] sm:$0xff]  ;;  %v36_v5 = vld [vmem:[#allocation3 + $0x18] sm:$0xff] }
   0x7   :  { %30 = vst.msk [vmem:[#allocation2 + $0x8] sm:$0xff] %vm28_vm0, %v93_v0  ;;  %v40_v6 = vadd.f32 %v36_v5, %v35_v4 }
   0x8   :  { %38 = vadd.xlane.f32.xlu0 %v37_v3 }
   0xd   :  { %v31_v7 = vld [vmem:[#allocation2] sm:$0xff] }
   0xe   :  { %v32_v10 = vld [vmem:[#allocation2 + $0x8] sm:$0xff] }
  0x10   :  { %41 = vadd.xlane.f32.xlu0 %v40_v6 }
  0x7b   :  { %v39_v8 = vpop.xlane.xlu0 %38 }
  0x7c   :  { %v43_v9 = vadd.f32 %v39_v8, %v31_v7 }
  0x7e   :  { %46 = vst.msk [vmem:[#allocation2] sm:$0xff] %vm28_vm0, %v43_v9 }
  0x83   :  { %v42_v11 = vpop.xlane.xlu0 %41 }
  0x84   :  { %v44_v12 = vadd.f32 %v42_v11, %v32_v10 }
  0x85   :  { %v51_v13 = vld [vmem:[#allocation2] sm:$0xff] }
  0x86   :  { %53 = vst.msk [vmem:[%s120_s1] sm:$0xff] %vm28_vm0, %v51_v13 }
  0x87   :  { %47 = vst.msk [vmem:[#allocation2 + $0x8] sm:$0xff] %vm28_vm0, %v44_v12 }
  0x8e   :  { %v52_v14 = vld [vmem:[#allocation2 + $0x8] sm:$0xff] }
  0x8f   :  { %54 = vst.msk [vmem:[%s120_s1 + $0x8] sm:$0xff] %vm28_vm0, %v52_v14 }
  0x90   :  { %59 = vsyncpa [#allocation4], 1 }

</bundles_post_ra>
